<compile_context>
chip_gen: v5e
topology: v5e:2x2
jax: 0.10.0
libtpu: 0.0.40
codegen_flags: <defaults>
</compile_context>

<pallas_src>
import jax
import jax.numpy as jnp
from jax.experimental import pallas as pl
from jax.experimental.pallas import tpu as pltpu


# ----------------------------- small OLMo config -----------------------------
VOCAB_SIZE = 128
HIDDEN = 64
NUM_HEADS = 4
HEAD_DIM = HIDDEN // NUM_HEADS          # 16
HALF = HEAD_DIM // 2                    # 8   (NeoX rotary half)
INTERMEDIATE = 128
NUM_LAYERS = 2
ROPE_THETA = 10000.0
CLIP_QKV = 8.0                          # config.clip_qkv
LN_EPS = 1e-5                           # torch.nn.LayerNorm default
SCALE = HEAD_DIM ** -0.5
SEQ_LEN = 8

PACK = NUM_HEADS * HALF                 # 32  lanes per rotary-half block
QK_WIDTH = 4 * PACK                     # 128 lanes: [q1 | k1 | q2 | k2]
QKV_WIDTH = QK_WIDTH + NUM_HEADS * HEAD_DIM   # 192 fused-QKV output lanes


# ----------------------------- fused Pallas kernel ----------------------------
def _layernorm(x):
    """Non-affine LayerNorm over last dim (elementwise_affine=False, bias=False)."""
    mu = jnp.mean(x, axis=-1, keepdims=True)
    var = jnp.mean(jnp.square(x - mu), axis=-1, keepdims=True)
    return (x - mu) * jax.lax.rsqrt(var + LN_EPS)


def olmo_fused_kernel(x_ref, cosf_ref, sinf_ref, bias_ref,
                      wqkv_ref, wo_ref, wgu_ref, wd_ref,
                      o_ref, h_ref):
    layer = pl.program_id(0)

    # ---- prologue: load embedded tokens into the resident residual stream ----
    @pl.when(layer == 0)
    def _():
        h_ref[...] = x_ref[...]

    x = h_ref[...]                                      # (T, H) f32 residual

    # ---- input_layernorm + fused QKV (ONE lane-dense MXU matmul) + clip_qkv ----
    hn = _layernorm(x).astype(jnp.bfloat16)             # (T, H) bf16
    qkv = jnp.dot(hn, wqkv_ref[...], preferred_element_type=jnp.float32)
    qkv = jnp.clip(qkv, -CLIP_QKV, CLIP_QKV)            # (T, 192) f32

    # ---- NeoX rotary on the lane-packed (T,128) [q1|k1|q2|k2] block ----------
    # rotate_half is a single 128-lane roll (XLU); cos/sin tables are passed in
    # pre-packed / pre-signed, so RoPE is two full-vreg VPU mul-adds.
    qk = qkv[:, :QK_WIDTH]                              # (T, 128)
    qk_rot = qk * cosf_ref[...] + pltpu.roll(qk, QK_WIDTH // 2, axis=1) * sinf_ref[...]

    # ---- slice to head-major for batched attention ---------------------------
    def heads(x2d, base, width):                        # -> (NH, T, width)
        return jnp.stack(
            [x2d[:, base + h * width: base + (h + 1) * width]
             for h in range(NUM_HEADS)], axis=0)

    qh = jnp.concatenate([heads(qk_rot, 0 * PACK, HALF),
                          heads(qk_rot, 2 * PACK, HALF)],
                         axis=-1).astype(jnp.bfloat16)  # (NH, T, HEAD_DIM)
    kh = jnp.concatenate([heads(qk_rot, 1 * PACK, HALF),
                          heads(qk_rot, 3 * PACK, HALF)],
                         axis=-1).astype(jnp.bfloat16)
    vh = heads(qkv, QK_WIDTH, HEAD_DIM).astype(jnp.bfloat16)   # (NH, T, HEAD_DIM)

    # ---- causal softmax attention, batched over heads -------------------------
    s = jnp.einsum('hqd,hkd->hqk', qh, kh,
                   preferred_element_type=jnp.float32) * SCALE
    s = s + bias_ref[...]                               # hoisted additive causal mask
    m = jnp.max(s, axis=-1, keepdims=True)
    p = jnp.exp(s - m)
    # approx reciprocal runs on the EUP slot; ~1e-3 rel. err vs exact softmax.
    p = p * pl.reciprocal(jnp.sum(p, axis=-1, keepdims=True), approx=True)

    attn = jnp.einsum('hqk,hkd->hqd', p.astype(jnp.bfloat16), vh,
                      preferred_element_type=jnp.float32)      # (NH, T, HEAD_DIM)

    # ---- o_proj (+ residual): ONE K=NH*HEAD_DIM matmul (head-sum in the MXU) --
    attn_flat = jnp.concatenate([attn[h] for h in range(NUM_HEADS)],
                                axis=-1).astype(jnp.bfloat16)  # (T, NH*HEAD_DIM)
    h1 = x + jnp.dot(attn_flat, wo_ref[...], preferred_element_type=jnp.float32)

    # ---- post_attention_layernorm + MLP (SiluAndMul) + residual ---------------
    h2 = _layernorm(h1).astype(jnp.bfloat16)
    gu = jnp.dot(h2, wgu_ref[...], preferred_element_type=jnp.float32)  # (T, 2I)
    gate = gu[:, :INTERMEDIATE]                         # 128-lane aligned slices
    up = gu[:, INTERMEDIATE:]
    act = (gate * jax.nn.sigmoid(gate) * up).astype(jnp.bfloat16)
    mlp_out = jnp.dot(act, wd_ref[...], preferred_element_type=jnp.float32)

    h_new = h1 + mlp_out
    h_ref[...] = h_new                                  # stays resident in VMEM

    # ---- epilogue: fused final (non-affine) LayerNorm on the last layer ------
    @pl.when(layer == pl.num_programs(0) - 1)
    def _():
        o_ref[...] = _layernorm(h_new)


# ----------------------------- wrapper ----------------------------------------
def olmo_model_fused(x, cosf, sinf, bias, wqkv, wo, wgu, wd):
    T, H = x.shape
    L = wqkv.shape[0]

    def act_spec(a):                     # constant-index, loaded once / revisited
        zeros = (0,) * a.ndim
        return pl.BlockSpec(tuple(a.shape), lambda l: zeros)

    def layer_spec(a):                   # per-layer weight streaming (prefetch l+1)
        zeros = (0,) * (a.ndim - 1)
        return pl.BlockSpec((None,) + tuple(a.shape[1:]), lambda l: (l,) + zeros)

    weights = (wqkv, wo, wgu, wd)
    return pl.pallas_call(
        olmo_fused_kernel,
        out_shape=jax.ShapeDtypeStruct((T, H), jnp.float32),
        grid=(L,),
        in_specs=[act_spec(x), act_spec(cosf), act_spec(sinf), act_spec(bias)]
                 + [layer_spec(w) for w in weights],
        out_specs=pl.BlockSpec((T, H), lambda l: (0, 0)),
        scratch_shapes=[pltpu.VMEM((T, H), jnp.float32)],
        compiler_params=pltpu.CompilerParams(
            dimension_semantics=("arbitrary",)),
    )(x, cosf, sinf, bias, *weights)


# ----------------------------- plain-JAX glue ----------------------------------
def make_rope_inputs(positions):
    """Lane-packed NeoX rotary tables matching the [q1|k1|q2|k2] qkv layout."""
    inv_freq = 1.0 / (ROPE_THETA ** (
        jnp.arange(0, HEAD_DIM, 2, dtype=jnp.float32) / HEAD_DIM))
    freqs = positions.astype(jnp.float32)[:, None] * inv_freq[None, :]   # (T, HALF)
    cos_p = jnp.tile(jnp.cos(freqs), (1, NUM_HEADS))                     # (T, PACK)
    sin_p = jnp.tile(jnp.sin(freqs), (1, NUM_HEADS))
    cosf = jnp.tile(cos_p, (1, 4))                                       # (T, 128)
    sinf = jnp.concatenate([-sin_p, -sin_p, sin_p, sin_p], axis=-1)      # (T, 128)
    return cosf, sinf


def make_causal_bias(seq_len):
    i = jnp.arange(seq_len)[:, None]
    j = jnp.arange(seq_len)[None, :]
    return jnp.where(j <= i, 0.0, -1e30).astype(jnp.float32)             # (T, T)


def init_params(key):
    ks = jax.random.split(key, 7)
    std = 0.02

    def normal(k, shape):
        return std * jax.random.normal(k, shape, jnp.float32)

    embed = normal(ks[0], (VOCAB_SIZE, HIDDEN))
    wq = normal(ks[1], (NUM_LAYERS, NUM_HEADS, HIDDEN, HEAD_DIM))
    wk = normal(ks[2], (NUM_LAYERS, NUM_HEADS, HIDDEN, HEAD_DIM))
    wv = normal(ks[3], (NUM_LAYERS, NUM_HEADS, HIDDEN, HEAD_DIM))
    wo = normal(ks[4], (NUM_LAYERS, NUM_HEADS, HEAD_DIM, HIDDEN))
    wgu = normal(ks[5], (NUM_LAYERS, HIDDEN, 2 * INTERMEDIATE))
    wd = normal(ks[6], (NUM_LAYERS, INTERMEDIATE, HIDDEN))

    def pack(w):   # (L, NH, HIDDEN, width) -> (L, HIDDEN, NH*width) head-major lanes
        return jnp.transpose(w, (0, 2, 1, 3)).reshape(NUM_LAYERS, HIDDEN, -1)

    # Fused QKV weight, columns = [q1 | k1 | q2 | k2 | v] (rotary halves pre-split).
    wqkv = jnp.concatenate([pack(wq[..., :HALF]), pack(wk[..., :HALF]),
                            pack(wq[..., HALF:]), pack(wk[..., HALF:]),
                            pack(wv)], axis=-1)                    # (L, H, 192)
    # o_proj flattened so the head-sum is a single K=NH*HEAD_DIM contraction.
    wo_flat = wo.reshape(NUM_LAYERS, NUM_HEADS * HEAD_DIM, HIDDEN)  # (L, 64, 64)

    bf = jnp.bfloat16
    return {"embed": embed,
            "wqkv": wqkv.astype(bf), "wo": wo_flat.astype(bf),
            "wgu": wgu.astype(bf), "wd": wd.astype(bf)}


@jax.jit
def olmo_forward(params, input_ids, positions):
    """Equivalent of OlmoForCausalLM.forward -> final hidden states (T, H)."""
    hidden = params["embed"][input_ids]                 # glue: embedding gather
    cosf, sinf = make_rope_inputs(positions)
    bias = make_causal_bias(input_ids.shape[0])
    return olmo_model_fused(hidden, cosf, sinf, bias,
                            params["wqkv"], params["wo"],
                            params["wgu"], params["wd"])


# ----------------------------- main -------------------------------------------
if __name__ == "__main__":
    key = jax.random.PRNGKey(0)
    k_param, k_ids = jax.random.split(key)
    params = init_params(k_param)

    input_ids = jax.random.randint(k_ids, (SEQ_LEN,), 0, VOCAB_SIZE, dtype=jnp.int32)
    positions = jnp.arange(SEQ_LEN, dtype=jnp.int32)

    out = olmo_forward(params, input_ids, positions)
    jax.block_until_ready(out)

    assert out.shape == (SEQ_LEN, HIDDEN)
    assert bool(jnp.all(jnp.isfinite(out)))
    print("KERNEL_OK")
</pallas_src>

<mosaic_0001>
module attributes {stable_mosaic.version = 11 : i64} {
  func.func @olmo_fused_kernel(%arg0: i32, %arg1: memref<8x64xf32, #tpu.memory_space<vmem>>, %arg2: memref<8x128xf32, #tpu.memory_space<vmem>>, %arg3: memref<8x128xf32, #tpu.memory_space<vmem>>, %arg4: memref<8x8xf32, #tpu.memory_space<vmem>>, %arg5: memref<1x64x192xbf16, #tpu.memory_space<vmem>>, %arg6: memref<1x64x64xbf16, #tpu.memory_space<vmem>>, %arg7: memref<1x64x256xbf16, #tpu.memory_space<vmem>>, %arg8: memref<1x128x64xbf16, #tpu.memory_space<vmem>>, %arg9: memref<8x64xf32, #tpu.memory_space<vmem>>, %arg10: memref<8x64xf32, #tpu.memory_space<vmem>>) attributes {dimension_semantics = [#tpu.dimension_semantics<arbitrary>], iteration_bounds = array<i64: 2>, scalar_prefetch = 0 : i64, scratch_operands = 1 : i64, tpu.core_type = #tpu.core_type<tc>, window_params = [{pipeline_mode = #tpu.pipeline_mode<synchronous>, transform_indices = @transform_0, window_bounds = array<i64: 8, 64>}, {pipeline_mode = #tpu.pipeline_mode<synchronous>, transform_indices = @transform_1, window_bounds = array<i64: 8, 128>}, {pipeline_mode = #tpu.pipeline_mode<synchronous>, transform_indices = @transform_2, window_bounds = array<i64: 8, 128>}, {pipeline_mode = #tpu.pipeline_mode<synchronous>, transform_indices = @transform_3, window_bounds = array<i64: 8, 8>}, {transform_indices = @transform_4, window_bounds = array<i64: 1, 64, 192>}, {transform_indices = @transform_5, window_bounds = array<i64: 1, 64, 64>}, {transform_indices = @transform_6, window_bounds = array<i64: 1, 64, 256>}, {transform_indices = @transform_7, window_bounds = array<i64: 1, 128, 64>}, {pipeline_mode = #tpu.pipeline_mode<synchronous>, transform_indices = @transform_8, window_bounds = array<i64: 8, 64>}]} {
    %c0_i32 = arith.constant 0 : i32
    %0 = arith.cmpi eq, %arg0, %c0_i32 : i32
    %1 = arith.extui %0 : i1 to i32
    %c0_i32_0 = arith.constant 0 : i32
    %2 = arith.cmpi ne, %1, %c0_i32_0 : i32
    scf.if %2 {
      %c0_44 = arith.constant 0 : index
      %c0_45 = arith.constant 0 : index
      %160 = vector.load %arg1[%c0_44, %c0_45] : memref<8x64xf32, #tpu.memory_space<vmem>>, vector<8x64xf32>
      %c0_46 = arith.constant 0 : index
      %c0_47 = arith.constant 0 : index
      %161 = vector.load %arg10[%c0_46, %c0_47] : memref<8x64xf32, #tpu.memory_space<vmem>>, vector<8x64xf32>
      tpu.vector_store %arg10[%c0_46, %c0_47], %160 {strides = array<i32>} : memref<8x64xf32, #tpu.memory_space<vmem>>, vector<8x64xf32>,
    } else {
    }
    %c0 = arith.constant 0 : index
    %c0_1 = arith.constant 0 : index
    %3 = vector.load %arg10[%c0, %c0_1] : memref<8x64xf32, #tpu.memory_space<vmem>>, vector<8x64xf32>
    %cst = arith.constant dense<0.000000e+00> : vector<8xf32>
    %4 = vector.multi_reduction <add>, %3, %cst [1] : vector<8x64xf32> to vector<8xf32>
    %5 = vector.shape_cast %4 : vector<8xf32> to vector<8x1xf32>
    %cst_2 = arith.constant 6.400000e+01 : f32
    %6 = vector.broadcast %cst_2 : f32 to vector<8x1xf32>
    %7 = arith.divf %5, %6 : vector<8x1xf32>
    %8 = vector.broadcast %7 : vector<8x1xf32> to vector<8x64xf32>
    %9 = arith.subf %3, %8 : vector<8x64xf32>
    %10 = arith.mulf %9, %9 : vector<8x64xf32>
    %cst_3 = arith.constant dense<0.000000e+00> : vector<8xf32>
    %11 = vector.multi_reduction <add>, %10, %cst_3 [1] : vector<8x64xf32> to vector<8xf32>
    %12 = vector.shape_cast %11 : vector<8xf32> to vector<8x1xf32>
    %cst_4 = arith.constant 6.400000e+01 : f32
    %13 = vector.broadcast %cst_4 : f32 to vector<8x1xf32>
    %14 = arith.divf %12, %13 : vector<8x1xf32>
    %15 = vector.broadcast %7 : vector<8x1xf32> to vector<8x64xf32>
    %16 = arith.subf %3, %15 : vector<8x64xf32>
    %cst_5 = arith.constant 9.99999974E-6 : f32
    %17 = vector.broadcast %cst_5 : f32 to vector<8x1xf32>
    %18 = arith.addf %14, %17 : vector<8x1xf32>
    %19 = math.rsqrt %18 : vector<8x1xf32>
    %20 = vector.broadcast %19 : vector<8x1xf32> to vector<8x64xf32>
    %21 = arith.mulf %16, %20 : vector<8x64xf32>
    %22 = arith.truncf %21 : vector<8x64xf32> to vector<8x64xbf16>
    %c0_6 = arith.constant 0 : index
    %c0_7 = arith.constant 0 : index
    %c0_8 = arith.constant 0 : index
    %23 = vector.load %arg5[%c0_6, %c0_7, %c0_8] : memref<1x64x192xbf16, #tpu.memory_space<vmem>>, vector<1x64x192xbf16>
    %24 = vector.shape_cast %23 : vector<1x64x192xbf16> to vector<64x192xbf16>
    %cst_9 = arith.constant dense<0.000000e+00> : vector<8x192xf32>
    %25 = tpu.matmul %22, %24, %cst_9 {dimension_numbers = #tpu.dot_dimension_numbers<[1], [0], [0], [1], [0, 0, 1, 1], [], []>} : vector<8x64xbf16>, vector<64x192xbf16>, vector<8x192xf32> -> vector<8x192xf32>
    %cst_10 = arith.constant -8.000000e+00 : f32
    %cst_11 = arith.constant 8.000000e+00 : f32
    %26 = vector.broadcast %cst_10 : f32 to vector<8x192xf32>
    %27 = arith.maximumf %26, %25 : vector<8x192xf32>
    %28 = vector.broadcast %cst_11 : f32 to vector<8x192xf32>
    %29 = arith.minimumf %28, %27 : vector<8x192xf32>
    %30 = vector.extract_strided_slice %29 {offsets = [0, 0], sizes = [8, 128], strides = [1, 1]} : vector<8x192xf32> to vector<8x128xf32>
    %c0_12 = arith.constant 0 : index
    %c0_13 = arith.constant 0 : index
    %31 = vector.load %arg2[%c0_12, %c0_13] : memref<8x128xf32, #tpu.memory_space<vmem>>, vector<8x128xf32>
    %32 = arith.mulf %30, %31 : vector<8x128xf32>
    %c64_i32 = arith.constant 64 : i32
    %33 = tpu.dynamic_rotate %30 by %c64_i32 dim 1 : vector<8x128xf32>, i32 -> vector<8x128xf32>
    %c0_14 = arith.constant 0 : index
    %c0_15 = arith.constant 0 : index
    %34 = vector.load %arg3[%c0_14, %c0_15] : memref<8x128xf32, #tpu.memory_space<vmem>>, vector<8x128xf32>
    %35 = arith.mulf %33, %34 : vector<8x128xf32>
    %36 = arith.addf %32, %35 : vector<8x128xf32>
    %37 = vector.extract_strided_slice %36 {offsets = [0, 0], sizes = [8, 8], strides = [1, 1]} : vector<8x128xf32> to vector<8x8xf32>
    %38 = vector.extract_strided_slice %36 {offsets = [0, 8], sizes = [8, 8], strides = [1, 1]} : vector<8x128xf32> to vector<8x8xf32>
    %39 = vector.extract_strided_slice %36 {offsets = [0, 16], sizes = [8, 8], strides = [1, 1]} : vector<8x128xf32> to vector<8x8xf32>
    %40 = vector.extract_strided_slice %36 {offsets = [0, 24], sizes = [8, 8], strides = [1, 1]} : vector<8x128xf32> to vector<8x8xf32>
    %41 = vector.shape_cast %37 : vector<8x8xf32> to vector<1x8x8xf32>
    %42 = vector.shape_cast %38 : vector<8x8xf32> to vector<1x8x8xf32>
    %43 = vector.shape_cast %39 : vector<8x8xf32> to vector<1x8x8xf32>
    %44 = vector.shape_cast %40 : vector<8x8xf32> to vector<1x8x8xf32>
    %45 = tpu.concatenate %41, %42, %43, %44 in 0 : vector<1x8x8xf32>, vector<1x8x8xf32>, vector<1x8x8xf32>, vector<1x8x8xf32> -> vector<4x8x8xf32>
    %46 = vector.extract_strided_slice %36 {offsets = [0, 64], sizes = [8, 8], strides = [1, 1]} : vector<8x128xf32> to vector<8x8xf32>
    %47 = vector.extract_strided_slice %36 {offsets = [0, 72], sizes = [8, 8], strides = [1, 1]} : vector<8x128xf32> to vector<8x8xf32>
    %48 = vector.extract_strided_slice %36 {offsets = [0, 80], sizes = [8, 8], strides = [1, 1]} : vector<8x128xf32> to vector<8x8xf32>
    %49 = vector.extract_strided_slice %36 {offsets = [0, 88], sizes = [8, 8], strides = [1, 1]} : vector<8x128xf32> to vector<8x8xf32>
    %50 = vector.shape_cast %46 : vector<8x8xf32> to vector<1x8x8xf32>
    %51 = vector.shape_cast %47 : vector<8x8xf32> to vector<1x8x8xf32>
    %52 = vector.shape_cast %48 : vector<8x8xf32> to vector<1x8x8xf32>
    %53 = vector.shape_cast %49 : vector<8x8xf32> to vector<1x8x8xf32>
    %54 = tpu.concatenate %50, %51, %52, %53 in 0 : vector<1x8x8xf32>, vector<1x8x8xf32>, vector<1x8x8xf32>, vector<1x8x8xf32> -> vector<4x8x8xf32>
    %55 = tpu.concatenate %45, %54 in 2 : vector<4x8x8xf32>, vector<4x8x8xf32> -> vector<4x8x16xf32>
    %56 = arith.truncf %55 : vector<4x8x16xf32> to vector<4x8x16xbf16>
    %57 = vector.extract_strided_slice %36 {offsets = [0, 32], sizes = [8, 8], strides = [1, 1]} : vector<8x128xf32> to vector<8x8xf32>
    %58 = vector.extract_strided_slice %36 {offsets = [0, 40], sizes = [8, 8], strides = [1, 1]} : vector<8x128xf32> to vector<8x8xf32>
    %59 = vector.extract_strided_slice %36 {offsets = [0, 48], sizes = [8, 8], strides = [1, 1]} : vector<8x128xf32> to vector<8x8xf32>
    %60 = vector.extract_strided_slice %36 {offsets = [0, 56], sizes = [8, 8], strides = [1, 1]} : vector<8x128xf32> to vector<8x8xf32>
    %61 = vector.shape_cast %57 : vector<8x8xf32> to vector<1x8x8xf32>
    %62 = vector.shape_cast %58 : vector<8x8xf32> to vector<1x8x8xf32>
    %63 = vector.shape_cast %59 : vector<8x8xf32> to vector<1x8x8xf32>
    %64 = vector.shape_cast %60 : vector<8x8xf32> to vector<1x8x8xf32>
    %65 = tpu.concatenate %61, %62, %63, %64 in 0 : vector<1x8x8xf32>, vector<1x8x8xf32>, vector<1x8x8xf32>, vector<1x8x8xf32> -> vector<4x8x8xf32>
    %66 = vector.extract_strided_slice %36 {offsets = [0, 96], sizes = [8, 8], strides = [1, 1]} : vector<8x128xf32> to vector<8x8xf32>
    %67 = vector.extract_strided_slice %36 {offsets = [0, 104], sizes = [8, 8], strides = [1, 1]} : vector<8x128xf32> to vector<8x8xf32>
    %68 = vector.extract_strided_slice %36 {offsets = [0, 112], sizes = [8, 8], strides = [1, 1]} : vector<8x128xf32> to vector<8x8xf32>
    %69 = vector.extract_strided_slice %36 {offsets = [0, 120], sizes = [8, 8], strides = [1, 1]} : vector<8x128xf32> to vector<8x8xf32>
    %70 = vector.shape_cast %66 : vector<8x8xf32> to vector<1x8x8xf32>
    %71 = vector.shape_cast %67 : vector<8x8xf32> to vector<1x8x8xf32>
    %72 = vector.shape_cast %68 : vector<8x8xf32> to vector<1x8x8xf32>
    %73 = vector.shape_cast %69 : vector<8x8xf32> to vector<1x8x8xf32>
    %74 = tpu.concatenate %70, %71, %72, %73 in 0 : vector<1x8x8xf32>, vector<1x8x8xf32>, vector<1x8x8xf32>, vector<1x8x8xf32> -> vector<4x8x8xf32>
    %75 = tpu.concatenate %65, %74 in 2 : vector<4x8x8xf32>, vector<4x8x8xf32> -> vector<4x8x16xf32>
    %76 = arith.truncf %75 : vector<4x8x16xf32> to vector<4x8x16xbf16>
    %77 = vector.extract_strided_slice %29 {offsets = [0, 128], sizes = [8, 16], strides = [1, 1]} : vector<8x192xf32> to vector<8x16xf32>
    %78 = vector.extract_strided_slice %29 {offsets = [0, 144], sizes = [8, 16], strides = [1, 1]} : vector<8x192xf32> to vector<8x16xf32>
    %79 = vector.extract_strided_slice %29 {offsets = [0, 160], sizes = [8, 16], strides = [1, 1]} : vector<8x192xf32> to vector<8x16xf32>
    %80 = vector.extract_strided_slice %29 {offsets = [0, 176], sizes = [8, 16], strides = [1, 1]} : vector<8x192xf32> to vector<8x16xf32>
    %81 = vector.shape_cast %77 : vector<8x16xf32> to vector<1x8x16xf32>
    %82 = vector.shape_cast %78 : vector<8x16xf32> to vector<1x8x16xf32>
    %83 = vector.shape_cast %79 : vector<8x16xf32> to vector<1x8x16xf32>
    %84 = vector.shape_cast %80 : vector<8x16xf32> to vector<1x8x16xf32>
    %85 = tpu.concatenate %81, %82, %83, %84 in 0 : vector<1x8x16xf32>, vector<1x8x16xf32>, vector<1x8x16xf32>, vector<1x8x16xf32> -> vector<4x8x16xf32>
    %86 = arith.truncf %85 : vector<4x8x16xf32> to vector<4x8x16xbf16>
    "tpu.trace_start"() <{level = 10 : i32, message = "hqd,hkd->hqk"}> : () -> ()
    %cst_16 = arith.constant dense<0.000000e+00> : vector<4x8x8xf32>
    %87 = tpu.matmul %56, %76, %cst_16 {dimension_numbers = #tpu.dot_dimension_numbers<[2], [2], [1], [1], [0, 0, 0, 1, 1, 1], [0], [0]>} : vector<4x8x16xbf16>, vector<4x8x16xbf16>, vector<4x8x8xf32> -> vector<4x8x8xf32>
    "tpu.trace_stop"() : () -> ()
    %cst_17 = arith.constant 2.500000e-01 : f32
    %88 = vector.broadcast %cst_17 : f32 to vector<4x8x8xf32>
    %89 = arith.mulf %87, %88 : vector<4x8x8xf32>
    %c0_18 = arith.constant 0 : index
    %c0_19 = arith.constant 0 : index
    %90 = vector.load %arg4[%c0_18, %c0_19] : memref<8x8xf32, #tpu.memory_space<vmem>>, vector<8x8xf32>
    %91 = vector.shape_cast %90 : vector<8x8xf32> to vector<1x8x8xf32>
    %92 = vector.broadcast %91 : vector<1x8x8xf32> to vector<4x8x8xf32>
    %93 = arith.addf %89, %92 : vector<4x8x8xf32>
    %cst_20 = arith.constant dense<0xFF800000> : vector<4x8xf32>
    %94 = vector.multi_reduction <maximumf>, %93, %cst_20 [2] : vector<4x8x8xf32> to vector<4x8xf32>
    %95 = vector.shape_cast %94 : vector<4x8xf32> to vector<4x8x1xf32>
    %96 = vector.broadcast %95 : vector<4x8x1xf32> to vector<4x8x8xf32>
    %97 = arith.subf %93, %96 : vector<4x8x8xf32>
    %98 = math.exp %97 : vector<4x8x8xf32>
    %cst_21 = arith.constant dense<0.000000e+00> : vector<4x8xf32>
    %99 = vector.multi_reduction <add>, %98, %cst_21 [2] : vector<4x8x8xf32> to vector<4x8xf32>
    %100 = vector.shape_cast %99 : vector<4x8xf32> to vector<4x8x1xf32>
    %101 = tpu.reciprocal %100 {approx = true} : vector<4x8x1xf32> -> vector<4x8x1xf32>
    %102 = vector.broadcast %101 : vector<4x8x1xf32> to vector<4x8x8xf32>
    %103 = arith.mulf %98, %102 : vector<4x8x8xf32>
    %104 = arith.truncf %103 : vector<4x8x8xf32> to vector<4x8x8xbf16>
    "tpu.trace_start"() <{level = 10 : i32, message = "hqk,hkd->hqd"}> : () -> ()
    %cst_22 = arith.constant dense<0.000000e+00> : vector<4x8x16xf32>
    %105 = tpu.matmul %104, %86, %cst_22 {dimension_numbers = #tpu.dot_dimension_numbers<[2], [1], [1], [2], [0, 0, 0, 1, 1, 2], [0], [0]>} : vector<4x8x8xbf16>, vector<4x8x16xbf16>, vector<4x8x16xf32> -> vector<4x8x16xf32>
    "tpu.trace_stop"() : () -> ()
    %106 = vector.extract_strided_slice %105 {offsets = [0, 0, 0], sizes = [1, 8, 16], strides = [1, 1, 1]} : vector<4x8x16xf32> to vector<1x8x16xf32>
    %107 = vector.shape_cast %106 : vector<1x8x16xf32> to vector<8x16xf32>
    %108 = vector.extract_strided_slice %105 {offsets = [1, 0, 0], sizes = [1, 8, 16], strides = [1, 1, 1]} : vector<4x8x16xf32> to vector<1x8x16xf32>
    %109 = vector.shape_cast %108 : vector<1x8x16xf32> to vector<8x16xf32>
    %110 = vector.extract_strided_slice %105 {offsets = [2, 0, 0], sizes = [1, 8, 16], strides = [1, 1, 1]} : vector<4x8x16xf32> to vector<1x8x16xf32>
    %111 = vector.shape_cast %110 : vector<1x8x16xf32> to vector<8x16xf32>
    %112 = vector.extract_strided_slice %105 {offsets = [3, 0, 0], sizes = [1, 8, 16], strides = [1, 1, 1]} : vector<4x8x16xf32> to vector<1x8x16xf32>
    %113 = vector.shape_cast %112 : vector<1x8x16xf32> to vector<8x16xf32>
    %114 = tpu.concatenate %107, %109, %111, %113 in 1 : vector<8x16xf32>, vector<8x16xf32>, vector<8x16xf32>, vector<8x16xf32> -> vector<8x64xf32>
    %115 = arith.truncf %114 : vector<8x64xf32> to vector<8x64xbf16>
    %c0_23 = arith.constant 0 : index
    %c0_24 = arith.constant 0 : index
    %c0_25 = arith.constant 0 : index
    %116 = vector.load %arg6[%c0_23, %c0_24, %c0_25] : memref<1x64x64xbf16, #tpu.memory_space<vmem>>, vector<1x64x64xbf16>
    %117 = vector.shape_cast %116 : vector<1x64x64xbf16> to vector<64x64xbf16>
    %cst_26 = arith.constant dense<0.000000e+00> : vector<8x64xf32>
    %118 = tpu.matmul %115, %117, %cst_26 {dimension_numbers = #tpu.dot_dimension_numbers<[1], [0], [0], [1], [0, 0, 1, 1], [], []>} : vector<8x64xbf16>, vector<64x64xbf16>, vector<8x64xf32> -> vector<8x64xf32>
    %119 = arith.addf %3, %118 : vector<8x64xf32>
    %cst_27 = arith.constant dense<0.000000e+00> : vector<8xf32>
    %120 = vector.multi_reduction <add>, %119, %cst_27 [1] : vector<8x64xf32> to vector<8xf32>
    %121 = vector.shape_cast %120 : vector<8xf32> to vector<8x1xf32>
    %cst_28 = arith.constant 6.400000e+01 : f32
    %122 = vector.broadcast %cst_28 : f32 to vector<8x1xf32>
    %123 = arith.divf %121, %122 : vector<8x1xf32>
    %124 = vector.broadcast %123 : vector<8x1xf32> to vector<8x64xf32>
    %125 = arith.subf %119, %124 : vector<8x64xf32>
    %126 = arith.mulf %125, %125 : vector<8x64xf32>
    %cst_29 = arith.constant dense<0.000000e+00> : vector<8xf32>
    %127 = vector.multi_reduction <add>, %126, %cst_29 [1] : vector<8x64xf32> to vector<8xf32>
    %128 = vector.shape_cast %127 : vector<8xf32> to vector<8x1xf32>
    %cst_30 = arith.constant 6.400000e+01 : f32
    %129 = vector.broadcast %cst_30 : f32 to vector<8x1xf32>
    %130 = arith.divf %128, %129 : vector<8x1xf32>
    %131 = vector.broadcast %123 : vector<8x1xf32> to vector<8x64xf32>
    %132 = arith.subf %119, %131 : vector<8x64xf32>
    %cst_31 = arith.constant 9.99999974E-6 : f32
    %133 = vector.broadcast %cst_31 : f32 to vector<8x1xf32>
    %134 = arith.addf %130, %133 : vector<8x1xf32>
    %135 = math.rsqrt %134 : vector<8x1xf32>
    %136 = vector.broadcast %135 : vector<8x1xf32> to vector<8x64xf32>
    %137 = arith.mulf %132, %136 : vector<8x64xf32>
    %138 = arith.truncf %137 : vector<8x64xf32> to vector<8x64xbf16>
    %c0_32 = arith.constant 0 : index
    %c0_33 = arith.constant 0 : index
    %c0_34 = arith.constant 0 : index
    %139 = vector.load %arg7[%c0_32, %c0_33, %c0_34] : memref<1x64x256xbf16, #tpu.memory_space<vmem>>, vector<1x64x256xbf16>
    %140 = vector.shape_cast %139 : vector<1x64x256xbf16> to vector<64x256xbf16>
    %cst_35 = arith.constant dense<0.000000e+00> : vector<8x256xf32>
    %141 = tpu.matmul %138, %140, %cst_35 {dimension_numbers = #tpu.dot_dimension_numbers<[1], [0], [0], [1], [0, 0, 1, 1], [], []>} : vector<8x64xbf16>, vector<64x256xbf16>, vector<8x256xf32> -> vector<8x256xf32>
    %142 = vector.extract_strided_slice %141 {offsets = [0, 0], sizes = [8, 128], strides = [1, 1]} : vector<8x256xf32> to vector<8x128xf32>
    %143 = vector.extract_strided_slice %141 {offsets = [0, 128], sizes = [8, 128], strides = [1, 1]} : vector<8x256xf32> to vector<8x128xf32>
    %144 = arith.negf %142 : vector<8x128xf32>
    %145 = math.exp %144 : vector<8x128xf32>
    %cst_36 = arith.constant 1.000000e+00 : f32
    %146 = vector.broadcast %cst_36 : f32 to vector<8x128xf32>
    %147 = arith.addf %146, %145 : vector<8x128xf32>
    %148 = arith.divf %146, %147 : vector<8x128xf32>
    %149 = arith.mulf %142, %148 : vector<8x128xf32>
    %150 = arith.mulf %149, %143 : vector<8x128xf32>
    %151 = arith.truncf %150 : vector<8x128xf32> to vector<8x128xbf16>
    %c0_37 = arith.constant 0 : index
    %c0_38 = arith.constant 0 : index
    %c0_39 = arith.constant 0 : index
    %152 = vector.load %arg8[%c0_37, %c0_38, %c0_39] : memref<1x128x64xbf16, #tpu.memory_space<vmem>>, vector<1x128x64xbf16>
    %153 = vector.shape_cast %152 : vector<1x128x64xbf16> to vector<128x64xbf16>
    %cst_40 = arith.constant dense<0.000000e+00> : vector<8x64xf32>
    %154 = tpu.matmul %151, %153, %cst_40 {dimension_numbers = #tpu.dot_dimension_numbers<[1], [0], [0], [1], [0, 0, 1, 1], [], []>} : vector<8x128xbf16>, vector<128x64xbf16>, vector<8x64xf32> -> vector<8x64xf32>
    %155 = arith.addf %119, %154 : vector<8x64xf32>
    %c0_41 = arith.constant 0 : index
    %c0_42 = arith.constant 0 : index
    %156 = vector.load %arg10[%c0_41, %c0_42] : memref<8x64xf32, #tpu.memory_space<vmem>>, vector<8x64xf32>
    tpu.vector_store %arg10[%c0_41, %c0_42], %155 {strides = array<i32>} : memref<8x64xf32, #tpu.memory_space<vmem>>, vector<8x64xf32>,
    %c1_i32 = arith.constant 1 : i32
    %157 = arith.cmpi eq, %arg0, %c1_i32 : i32
    %158 = arith.extui %157 : i1 to i32
    %c0_i32_43 = arith.constant 0 : i32
    %159 = arith.cmpi ne, %158, %c0_i32_43 : i32
    scf.if %159 {
      %cst_44 = arith.constant dense<0.000000e+00> : vector<8xf32>
      %160 = vector.multi_reduction <add>, %155, %cst_44 [1] : vector<8x64xf32> to vector<8xf32>
      %161 = vector.shape_cast %160 : vector<8xf32> to vector<8x1xf32>
      %cst_45 = arith.constant 6.400000e+01 : f32
      %162 = vector.broadcast %cst_45 : f32 to vector<8x1xf32>
      %163 = arith.divf %161, %162 : vector<8x1xf32>
      %164 = vector.broadcast %163 : vector<8x1xf32> to vector<8x64xf32>
      %165 = arith.subf %155, %164 : vector<8x64xf32>
      %166 = arith.mulf %165, %165 : vector<8x64xf32>
      %cst_46 = arith.constant dense<0.000000e+00> : vector<8xf32>
      %167 = vector.multi_reduction <add>, %166, %cst_46 [1] : vector<8x64xf32> to vector<8xf32>
      %168 = vector.shape_cast %167 : vector<8xf32> to vector<8x1xf32>
      %cst_47 = arith.constant 6.400000e+01 : f32
      %169 = vector.broadcast %cst_47 : f32 to vector<8x1xf32>
      %170 = arith.divf %168, %169 : vector<8x1xf32>
      %171 = vector.broadcast %163 : vector<8x1xf32> to vector<8x64xf32>
      %172 = arith.subf %155, %171 : vector<8x64xf32>
      %cst_48 = arith.constant 9.99999974E-6 : f32
      %173 = vector.broadcast %cst_48 : f32 to vector<8x1xf32>
      %174 = arith.addf %170, %173 : vector<8x1xf32>
      %175 = math.rsqrt %174 : vector<8x1xf32>
      %176 = vector.broadcast %175 : vector<8x1xf32> to vector<8x64xf32>
      %177 = arith.mulf %172, %176 : vector<8x64xf32>
      %c0_49 = arith.constant 0 : index
      %c0_50 = arith.constant 0 : index
      %178 = vector.load %arg9[%c0_49, %c0_50] : memref<8x64xf32, #tpu.memory_space<vmem>>, vector<8x64xf32>
      tpu.vector_store %arg9[%c0_49, %c0_50], %177 {strides = array<i32>} : memref<8x64xf32, #tpu.memory_space<vmem>>, vector<8x64xf32>,
    } else {
    }
    return
  }
  func.func @transform_0(%arg0: i32) -> (i32, i32) {
    %c0_i32 = arith.constant 0 : i32
    %c0_i32_0 = arith.constant 0 : i32
    %c0_i32_1 = arith.constant 0 : i32
    return %c0_i32, %c0_i32_0 : i32, i32
  }
  func.func @transform_1(%arg0: i32) -> (i32, i32) {
    %c0_i32 = arith.constant 0 : i32
    %c0_i32_0 = arith.constant 0 : i32
    %c0_i32_1 = arith.constant 0 : i32
    return %c0_i32, %c0_i32_0 : i32, i32
  }
  func.func @transform_2(%arg0: i32) -> (i32, i32) {
    %c0_i32 = arith.constant 0 : i32
    %c0_i32_0 = arith.constant 0 : i32
    %c0_i32_1 = arith.constant 0 : i32
    return %c0_i32, %c0_i32_0 : i32, i32
  }
  func.func @transform_3(%arg0: i32) -> (i32, i32) {
    %c0_i32 = arith.constant 0 : i32
    %c0_i32_0 = arith.constant 0 : i32
    %c0_i32_1 = arith.constant 0 : i32
    return %c0_i32, %c0_i32_0 : i32, i32
  }
  func.func @transform_4(%arg0: i32) -> (i32, i32, i32) {
    %c0_i32 = arith.constant 0 : i32
    %c0_i32_0 = arith.constant 0 : i32
    %c0_i32_1 = arith.constant 0 : i32
    return %arg0, %c0_i32, %c0_i32_0 : i32, i32, i32
  }
  func.func @transform_5(%arg0: i32) -> (i32, i32, i32) {
    %c0_i32 = arith.constant 0 : i32
    %c0_i32_0 = arith.constant 0 : i32
    %c0_i32_1 = arith.constant 0 : i32
    return %arg0, %c0_i32, %c0_i32_0 : i32, i32, i32
  }
  func.func @transform_6(%arg0: i32) -> (i32, i32, i32) {
    %c0_i32 = arith.constant 0 : i32
    %c0_i32_0 = arith.constant 0 : i32
    %c0_i32_1 = arith.constant 0 : i32
    return %arg0, %c0_i32, %c0_i32_0 : i32, i32, i32
  }
  func.func @transform_7(%arg0: i32) -> (i32, i32, i32) {
    %c0_i32 = arith.constant 0 : i32
    %c0_i32_0 = arith.constant 0 : i32
    %c0_i32_1 = arith.constant 0 : i32
    return %arg0, %c0_i32, %c0_i32_0 : i32, i32, i32
  }
  func.func @transform_8(%arg0: i32) -> (i32, i32) {
    %c0_i32 = arith.constant 0 : i32
    %c0_i32_0 = arith.constant 0 : i32
    %c0_i32_1 = arith.constant 0 : i32
    return %c0_i32, %c0_i32_0 : i32, i32
  }
}

</mosaic_0001>

<bundles_post_ra>
// kernel: neg.2
= control target key start
LH: loop header
LB: loop body
LE: loop exit
PB: predicated region body
PF: predicated region fallthrough
CT: control target
= control target key end

     0   :  { %s24_s0 = inlined_call_operand.vmem [shape: f32[8,32], index: 0, kind: input, shape index: {}]   ;;  %s25_s1 = inlined_call_operand.vmem [shape: f32[8,32], index: 1, kind: output, shape index: {}]  }
   0x1   :  { %v2_v0 = vld [vmem:[%s24_s0] sm:$0xff] }
   0x2   :  { %v5_v1 = vxor.u32 2147483648, %v2_v0 }
   0x4   :  { %7 = vst [vmem:[%s25_s1] sm:$0xff] %v5_v1 }

// kernel: tile.22
= control target key start
LH: loop header
LB: loop body
LE: loop exit
PB: predicated region body
PF: predicated region fallthrough
CT: control target
= control target key end

     0   :  { %vm36_vm0 = vcmask 1047556   ;;  %s81_s22 = smov 8   ;;  %s82_s23 = smov 16   ;;  %vm38_vm1 = vcmask 64512   ;;  %vm48_vm2 = vcmask 261312   ;;  %vm58_vm3 = vcmask 195712   ;;  %s133_s0 = inlined_call_operand.vmem [shape: f32[8,4,8], index: 0, kind: input, shape index: {}]   ;;  %s134_s1 = inlined_call_operand.vmem [shape: f32[8,32], index: 1, kind: output, shape index: {}]  }
   0x1   :  { %v70_v0 = vld [vmem:[%s133_s0 + $0x1c] sm:$0xf]  ;;  %v71_v1 = vld [vmem:[%s133_s0 + $0x18] sm:$0xf]  ;;  %v72_v2 = vld [vmem:[%s133_s0 + $0x14] sm:$0xf] }
   0x2   :  { %7 = vst [vmem:[#allocation0 + $0x38] sm:$0xf] %v70_v0  ;;  %v73_v3 = vld [vmem:[%s133_s0 + $0x10] sm:$0xf]  ;;  %v74_v4 = vld [vmem:[%s133_s0 + $0xc] sm:$0xf] }
   0x3   :  { %11 = vst [vmem:[#allocation0 + $0x30] sm:$0xf] %v71_v1  ;;  %v75_v5 = vld [vmem:[%s133_s0 + $0x8] sm:$0xf]  ;;  %v76_v6 = vld [vmem:[%s133_s0 + $0x4] sm:$0xf] }
   0x4   :  { %15 = vst [vmem:[#allocation0 + $0x28] sm:$0xf] %v72_v2  ;;  %v32_v7 = vld [vmem:[%s133_s0] sm:$0xf]  ;;  %s80_s0 = smov 24   ;;  %vm68_vm4 = vcmask 130112  }
   0x5   :  { %19 = vst [vmem:[#allocation0 + $0x20] sm:$0xf] %v73_v3 }
   0x6   :  { %23 = vst [vmem:[#allocation0 + $0x18] sm:$0xf] %v74_v4 }
   0x7   :  { %27 = vst [vmem:[#allocation0 + $0x10] sm:$0xf] %v75_v5 }
   0x8   :  { %31 = vst [vmem:[#allocation0 + $0x8] sm:$0xf] %v76_v6 }
   0x9   :  { %33 = vst [vmem:[#allocation0] sm:$0xf] %v32_v7 }
   0xc   :  { %v43_v8 = vld [vmem:[#allocation0 + $0x3] ss:$8 sm:$0xf0]   ;;  %v63_v9 = vld [vmem:[#allocation0 + $0x1] ss:$8 sm:$0xf0]  }
   0xd   :  { %v53_v15 = vld [vmem:[#allocation0 + $0x2] ss:$8 sm:$0xf0]   ;;  %v35_v18 = vld [vmem:[#allocation0] ss:$8 sm:$0xf0]  }
  0x10   :  { %v41_v10 = vld [vmem:[#allocation0 + $0x3] ss:$8 sm:$0xf]   ;;  %v61_v12 = vld [vmem:[#allocation0 + $0x1] ss:$8 sm:$0xf]  }
  0x11   :  { %v45_v11 = vsel %vm36_vm0, %v43_v8, %v41_v10  ;;  %v65_v13 = vsel %vm36_vm0, %v63_v9, %v61_v12  ;;  %v51_v14 = vld [vmem:[#allocation0 + $0x2] ss:$8 sm:$0xf]   ;;  %v34_v17 = vld [vmem:[#allocation0] ss:$8 sm:$0xf]  }
  0x12   :  { %46 = vrot.lane.b32.xlu0 %v45_v11, %s80_s0  ;;  %66 = vrot.lane.b32.xlu1 %v65_v13, %s81_s22  ;;  %v55_v16 = vsel %vm36_vm0, %v53_v15, %v51_v14  ;;  %v37_v19 = vsel %vm36_vm0, %v35_v18, %v34_v17 }
  0x13   :  { %39 = vst.msk [vmem:[%s134_s1] sm:$0xff] %vm38_vm1, %v37_v19  }
  0x1a   :  { %56 = vrot.lane.b32.xlu0 %v55_v16, %s82_s23 }
  0x84   :  { %v47_v20 = vpop.permute.xlu0 %46   ;;  %v67_v21 = vpop.permute.xlu1 %66  }
  0x85   :  { %49 = vst.msk [vmem:[%s134_s1] sm:$0xff] %vm48_vm2, %v47_v20  }
  0x8c   :  { %v57_v22 = vpop.permute.xlu0 %56  }
  0x8d   :  { %59 = vst.msk [vmem:[%s134_s1] sm:$0xff] %vm58_vm3, %v57_v22  }
  0x8e   :  { %69 = vst.msk [vmem:[%s134_s1] sm:$0xff] %vm68_vm4, %v67_v21  }

// kernel: tile.27
= control target key start
LH: loop header
LB: loop body
LE: loop exit
PB: predicated region body
PF: predicated region fallthrough
CT: control target
= control target key end

     0   :  { %vm36_vm0 = vcmask 1047556   ;;  %s81_s22 = smov 32   ;;  %s82_s23 = smov 64   ;;  %vm38_vm1 = vcmask 261120   ;;  %vm48_vm2 = vcmask 1048320   ;;  %vm58_vm3 = vcmask 785920   ;;  %s133_s0 = inlined_call_operand.vmem [shape: f32[8,4,32], index: 0, kind: input, shape index: {}]   ;;  %s134_s1 = inlined_call_operand.vmem [shape: f32[8,128], index: 1, kind: output, shape index: {}]  }
   0x1   :  { %v70_v0 = vld [vmem:[%s133_s0 + $0x1c] sm:$0xf]  ;;  %v71_v1 = vld [vmem:[%s133_s0 + $0x18] sm:$0xf]  ;;  %v72_v2 = vld [vmem:[%s133_s0 + $0x14] sm:$0xf] }
   0x2   :  { %7 = vst [vmem:[#allocation0 + $0x38] sm:$0xf] %v70_v0  ;;  %v73_v3 = vld [vmem:[%s133_s0 + $0x10] sm:$0xf]  ;;  %v74_v4 = vld [vmem:[%s133_s0 + $0xc] sm:$0xf] }
   0x3   :  { %11 = vst [vmem:[#allocation0 + $0x30] sm:$0xf] %v71_v1  ;;  %v75_v5 = vld [vmem:[%s133_s0 + $0x8] sm:$0xf]  ;;  %v76_v6 = vld [vmem:[%s133_s0 + $0x4] sm:$0xf] }
   0x4   :  { %15 = vst [vmem:[#allocation0 + $0x28] sm:$0xf] %v72_v2  ;;  %v32_v7 = vld [vmem:[%s133_s0] sm:$0xf]  ;;  %s80_s0 = smov 96   ;;  %vm68_vm4 = vcmask 523520  }
   0x5   :  { %19 = vst [vmem:[#allocation0 + $0x20] sm:$0xf] %v73_v3 }
   0x6   :  { %23 = vst [vmem:[#allocation0 + $0x18] sm:$0xf] %v74_v4 }
   0x7   :  { %27 = vst [vmem:[#allocation0 + $0x10] sm:$0xf] %v75_v5 }
   0x8   :  { %31 = vst [vmem:[#allocation0 + $0x8] sm:$0xf] %v76_v6 }
   0x9   :  { %33 = vst [vmem:[#allocation0] sm:$0xf] %v32_v7 }
   0xc   :  { %v43_v8 = vld [vmem:[#allocation0 + $0x3] ss:$8 sm:$0xf0]   ;;  %v63_v9 = vld [vmem:[#allocation0 + $0x1] ss:$8 sm:$0xf0]  }
   0xd   :  { %v53_v15 = vld [vmem:[#allocation0 + $0x2] ss:$8 sm:$0xf0]   ;;  %v35_v18 = vld [vmem:[#allocation0] ss:$8 sm:$0xf0]  }
  0x10   :  { %v41_v10 = vld [vmem:[#allocation0 + $0x3] ss:$8 sm:$0xf]   ;;  %v61_v12 = vld [vmem:[#allocation0 + $0x1] ss:$8 sm:$0xf]  }
  0x11   :  { %v45_v11 = vsel %vm36_vm0, %v43_v8, %v41_v10  ;;  %v65_v13 = vsel %vm36_vm0, %v63_v9, %v61_v12  ;;  %v51_v14 = vld [vmem:[#allocation0 + $0x2] ss:$8 sm:$0xf]   ;;  %v34_v17 = vld [vmem:[#allocation0] ss:$8 sm:$0xf]  }
  0x12   :  { %46 = vrot.lane.b32.xlu0 %v45_v11, %s80_s0  ;;  %66 = vrot.lane.b32.xlu1 %v65_v13, %s81_s22  ;;  %v55_v16 = vsel %vm36_vm0, %v53_v15, %v51_v14  ;;  %v37_v19 = vsel %vm36_vm0, %v35_v18, %v34_v17 }
  0x13   :  { %39 = vst.msk [vmem:[%s134_s1] sm:$0xff] %vm38_vm1, %v37_v19  }
  0x1a   :  { %56 = vrot.lane.b32.xlu0 %v55_v16, %s82_s23 }
  0x84   :  { %v47_v20 = vpop.permute.xlu0 %46   ;;  %v67_v21 = vpop.permute.xlu1 %66  }
  0x85   :  { %49 = vst.msk [vmem:[%s134_s1] sm:$0xff] %vm48_vm2, %v47_v20  }
  0x8c   :  { %v57_v22 = vpop.permute.xlu0 %56  }
  0x8d   :  { %59 = vst.msk [vmem:[%s134_s1] sm:$0xff] %vm58_vm3, %v57_v22  }
  0x8e   :  { %69 = vst.msk [vmem:[%s134_s1] sm:$0xff] %vm68_vm4, %v67_v21  }

// kernel: olmo_forward.1
= control target key start
LH: loop header
LB: loop body
LE: loop exit
PB: predicated region body
PF: predicated region fallthrough
CT: control target
= control target key end

     0   :  { %13 = vsyncpa [#allocation4], 0  ;;  %s1493_s27 = smov 0   ;;  %s1667_s0 = inlined_call_operand.vmem [shape: f32[8,64], index: 0, kind: input, shape index: {}]   ;;  %s1668_s1 = inlined_call_operand.vmem [shape: f32[8,128], index: 1, kind: input, shape index: {}]   ;;  %s1669_s2 = inlined_call_operand.vmem [shape: f32[8,128], index: 2, kind: input, shape index: {}]   ;;  %s1670_s3 = inlined_call_operand.vmem [shape: f32[8,8], index: 3, kind: input, shape index: {}]   ;;  %s1671_s4 = inlined_call_operand.vmem [shape: bf16[2,64,192], index: 4, kind: input, shape index: {}]   ;;  %s1672_s5 = inlined_call_operand.vmem [shape: bf16[2,64,64], index: 5, kind: input, shape index: {}]   ;;  %s1673_s6 = inlined_call_operand.vmem [shape: bf16[2,64,256], index: 6, kind: input, shape index: {}]   ;;  %s1674_s7 = inlined_call_operand.vmem [shape: bf16[2,128,64], index: 7, kind: input, shape index: {}]   ;;  %s1675_s8 = inlined_call_operand.hbm [shape: f32[8,64], index: 8, kind: output, shape index: {}]  }
   0x1 LB: > { %s1499_s28 = sadd.s32 4294967295, %s1433_s27   ;;  %p1150_p0 = scmp.ge.s32.totalorder %s1433_s27, 1  ;;  %s1433_s27 = sphi %s1493_s27, %s19_s27  }
   0x2   : > { %p288_p1 = scmp.lt.s32.totalorder %s1433_s27, 3 }
   0x4   : > { %p289_p2 = pnand %p1150_p0, %p288_p1 }
   0x5   : > { %p332_p3 = scmp.lt.s32.totalorder (!%p289_p2), %s1499_s28, 1  ;;  %p1159_p4 = scmp.ne.s32.totalorder (!%p289_p2), %s1499_s28, 0 }
   0x6   : > { %292 = sbr.rel (%p289_p2) target bundleno = 2406 (0x966), region = 52 }
   0xb   : > { %s333_s29 = scalar_select %p332_p3, %s1499_s28, 1 }
   0xc   : > { %356 = sbr.rel (%p1159_p4) target bundleno = 19 (0x13), region = 56 }
   0xd   : > { %s1293_s30 = sshll.u32 %s333_s29, 6  ;;  %s1294_s9 = sshll.u32 %s333_s29, 5 }
   0xe   : > { %s1508_s12 = scalar_lea.vmem %s1671_s4, %s1293_s30  ;;  %s1513_s15 = scalar_lea.vmem %s1672_s5, %s1294_s9 }
   0xf   : > { %s1518_s18 = scalar_lea.vmem %s1673_s6, %s1293_s30  ;;  %s1523_s21 = scalar_lea.vmem %s1674_s7, %s1293_s30 }
  0x11   : > { %v357_v0 = vld [vmem:[%s1667_s0] sm:$0xff]  ;;  %vm358_vm0 = vcmask 523264  }
  0x12   : > { %359 = vst.msk [vmem:[#allocation2] sm:$0xff] %vm358_vm0, %v357_v0 }
  0x13 PF: > { %vm361_vm1 = vcmask 523264   ;;  %v1435_v3 = vmov 64.0   ;;  %v1186_v15 = vld [vmem:[%s1508_s12 + $0x30] sm:$0xf]  ;;  %v1304_v16 = vld [vmem:[%s1508_s12 + $0x34] sm:$0xf0] }
  0x14   : > { %1367 = vrcp.f32 %v1435_v3  ;;  %v1303_v17 = vld [vmem:[%s1508_s12 + $0x34] sm:$0xf]  ;;  %v1187_v18 = vor.u32 %v1304_v16, %v1186_v15  ;;  %v1188_v19 = vld [vmem:[%s1508_s12 + $0x38] sm:$0xf0]  ;;  %v1178_v21 = vld [vmem:[%s1508_s12 + $0x20] sm:$0xf] }
  0x15   : > { %v1191_v20 = vor.u32 %v1303_v17, %v1188_v19  ;;  %v1302_v22 = vld [vmem:[%s1508_s12 + $0x24] sm:$0xf0]  ;;  %v1301_v23 = vld [vmem:[%s1508_s12 + $0x24] sm:$0xf]  ;;  %v1180_v25 = vld [vmem:[%s1508_s12 + $0x28] sm:$0xf0] }
  0x16   : > { %447 = vmatpush.bf16.msra.mxu0 %v1187_v18  ;;  %v1179_v24 = vor.u32 %v1302_v22, %v1178_v21  ;;  %v1183_v26 = vor.u32 %v1301_v23, %v1180_v25  ;;  %v1170_v27 = vld [vmem:[%s1508_s12 + $0x10] sm:$0xf]  ;;  %v1300_v28 = vld [vmem:[%s1508_s12 + $0x14] sm:$0xf0]  ;;  %v1299_v29 = vld [vmem:[%s1508_s12 + $0x14] sm:$0xf] }
  0x17   : > { %460 = vmatpush.bf16.msra.mxu1 %v1191_v20  ;;  %v1171_v30 = vor.u32 %v1300_v28, %v1170_v27  ;;  %v1172_v31 = vld [vmem:[%s1508_s12 + $0x18] sm:$0xf0]  ;;  %v1162_v32 = vld [vmem:[%s1508_s12] sm:$0xf]  ;;  %v1298_v33 = vld [vmem:[%s1508_s12 + $0x4] sm:$0xf0] }
  0x18   : > { %v1175_v34 = vor.u32 %v1299_v29, %v1172_v31  ;;  %v1297_v35 = vld [vmem:[%s1508_s12 + $0x4] sm:$0xf]  ;;  %v1164_v36 = vld [vmem:[%s1508_s12 + $0x8] sm:$0xf0]  ;;  %v1163_v37 = vor.u32 %v1298_v33, %v1162_v32  ;;  %s1436_s24 = smov 64   ;;  %s1437_s9 = smov 96  }
  0x19   : > { %v1529_v1 = vld [vmem:[#allocation2] sm:$0xff]  ;;  %v1167_v38 = vor.u32 %v1297_v35, %v1164_v36  ;;  %s1438_s10 = smov 104   ;;  %s1439_s11 = smov 112   ;;  %vm502_vm6 = vcmask 64512   ;;  %vm557_vm7 = vcmask 130048   ;;  %vm694_vm8 = vcmask 1043456  }
  0x1a   : > { %v362_v2 = vsel %vm361_vm1, %v1529_v1, 0.0  ;;  %v1368_v4 = vpop.eup %1367  ;;  %448 = vmatpush.bf16.msra.mxu0 %v1179_v24  ;;  %v473_v56 = vld [vmem:[%s1668_s1] sm:$0xff]  ;;  %s1440_s12 = smov 120   ;;  %s1441_s13 = smov 40   ;;  %vm781_vm9 = vcmask 261120   ;;  %vm783_vm10 = vcmask 392192  }
  0x1b   : > { %363 = vadd.xlane.f32.xlu0 %v362_v2  ;;  %v366_v5 = vmul.f32 64.0, %v1368_v4  ;;  %vm370_vm2 = vweird.f32 %v1368_v4  ;;  %461 = vmatpush.bf16.msra.mxu1 %v1183_v26  ;;  %v477_v57 = vld [vmem:[%s1669_s2] sm:$0xff]  ;;  %s1442_s14 = smov 72   ;;  %s1443_s19 = smov 80  }
  0x1c   : > { %s1444_s20 = smov 32   ;;  %s1445_s22 = smov 16  }
  0x1d   : > { %v367_v6 = vsub.f32 1.0, %v366_v5  ;;  %s1446_s23 = smov 48   ;;  %p1288_p5 = scmp.ne.s32.totalorder %s1499_s28, 1 }
  0x1e   : > { %449 = vmatpush.bf16.msra.mxu0 %v1171_v30 }
  0x1f   : > { %v368_v7 = vmul.f32 %v1368_v4, %v367_v6  ;;  %462 = vmatpush.bf16.msra.mxu1 %v1175_v34 }
  0x21   : > { %v369_v8 = vadd.f32 %v1368_v4, %v368_v7 }
  0x22   : > { %450 = vmatpush.bf16.msra.mxu0 %v1163_v37 }
  0x23   : > { %v1533_v9 = vsel %vm370_vm2, %v1368_v4, %v369_v8  ;;  %463 = vmatpush.bf16.msra.mxu1 %v1167_v38 }
  0x8e   : > { %v364_v10 = vpop.xlane.xlu0 %363 }
  0x8f   : > { %v372_v11 = vmul.f32 %v1533_v9, %v364_v10 }
  0x91   : > { %v373_v12 = vsub.f32 %v1529_v1, %v372_v11 }
  0x93   : > { %v374_v13 = vmul.f32 %v373_v12, %v373_v12 }
  0x95   : > { %v375_v14 = vsel %vm361_vm1, %v374_v13, 0.0 }
  0x96   : > { %376 = vadd.xlane.f32.xlu0 %v375_v14 }
 0x109   : > { %v377_v39 = vpop.xlane.xlu0 %376 }
 0x10a   : > { %v378_v40 = vmul.f32 %v377_v39, %v1533_v9 }
 0x10c   : > { %v379_v41 = vadd.f32 1e-05, %v378_v40 }
 0x10e   : > { %1369 = vrsqrt.f32 %v379_v41  ;;  %vm386_vm4 = vweird.f32 %v379_v41 }
 0x114   : > { %v1370_v42 = vpop.eup %1369 }
 0x115   : > { %v381_v43 = vmul.f32 %v1370_v42, %v379_v41  ;;  %vm387_vm3 = vweird.f32 %v1370_v42 }
 0x116   : > { %vm388_vm5 = vmor %vm386_vm4, %vm387_vm3 }
 0x117   : > { %v382_v44 = vmul.f32 %v1370_v42, %v381_v43 }
 0x119   : > { %v383_v45 = vmul.f32 0.5, %v382_v44 }
 0x11b   : > { %v384_v46 = vsub.f32 1.5, %v383_v45 }
 0x11d   : > { %v385_v47 = vmul.f32 %v1370_v42, %v384_v46 }
 0x11f   : > { %v389_v48 = vsel %vm388_vm5, %v1370_v42, %v385_v47 }
 0x120   : > { %v390_v49 = vmul.f32 %v389_v48, %v373_v12 }
 0x122   : > { %v391_v50 = vpack.c.bf16 %v390_v49, %v390_v49 }
 0x124   : > { %1192 = vmatmul.msk.bf16.vlgmr.msra.gmra.mxu0 %vm361_vm1, %v391_v50  ;;  %1193 = vmatmul.msk.bf16.vlgmr.msra.gmra.mxu1 %vm361_vm1, %v391_v50  ;;  %v638_v50 = vld [vmem:[%s1670_s3] sm:$0xff] }
 0x1a1   : > { %v452_v51 = vpop.f32.mrf.mxu0  ;;  %v465_v52 = vpop.f32.mrf.mxu1 }
 0x1a2   : > { %v1194_v53 = vclamps-f32 %v452_v51, 8.0  ;;  %v1571_v13 = vclamps-f32 %v465_v52, 8.0 }
 0x1a4   : > { %475 = vrot.lane.b32.xlu1 %v1194_v53, %s1436_s24  ;;  %v474_v59 = vmul.f32 %v1194_v53, %v473_v56  ;;  %v553_v17 = vpack.c.bf16 %v1571_v13, %v1571_v13 }
 0x1a6   : > { %v696_v20 = vsel %vm694_vm8, %v553_v17, 0 }
 0x1a9   : > { %v454_v54 = vpop.f32.mrf.mxu0  ;;  %v467_v55 = vpop.f32.mrf.mxu1 }
 0x216   : > { %v476_v58 = vpop.permute.xlu1 %475 }
 0x217   : > { %v478_v60 = vmul.f32 %v477_v57, %v476_v58 }
 0x219   : > { %v479_v61 = vadd.f32 %v478_v60, %v474_v59 }
 0x21b   : > { %511 = vrot.lane.b32.xlu0 %v479_v61, %s1437_s9  ;;  %487 = vrot.lane.b32.xlu2 %v479_v61, %s1438_s10 }
 0x21c   : > { %484 = vrot.lane.b32.xlu1 %v479_v61, %s1439_s11 }
 0x223   : > { %481 = vrot.lane.b32.xlu2 %v479_v61, %s1440_s12 }
 0x224   : > { %523 = vrot.lane.b32.xlu1 %v479_v61, %s1441_s13 }
 0x22b   : > { %490 = vrot.lane.b32.xlu2 %v479_v61, %s1442_s14 }
 0x275   : > { %v488_v62 = vpop.permute.xlu2 %487 }
 0x27d   : > { %v482_v63 = vpop.permute.xlu2 %481 }
 0x27e   : > { %525 = vrot.lane.b32.xlu0 %v482_v63, %s1441_s13 }
 0x285   : > { %v491_v7 = vpop.permute.xlu2 %490 }
 0x286   : > { %v503_v10 = vsel %vm502_vm6, %v479_v61, %v491_v7 }
 0x287   : > { %v507_v11 = vpack.c.bf16 %v503_v10, %v503_v10 }
 0x28d   : > { %v512_v3 = vpop.permute.xlu0 %511 }
 0x28e   : > { %v485_v0 = vpop.permute.xlu1 %484 }
 0x28f   : > { %v1357_v2 = vpack.i.bf16 %v488_v62, %v485_v0 }
 0x291   : > { %1358 = vrot.lane.b32.xlu2 %v1357_v2, %s1441_s13  ;;  %1353 = vrot.lane.b32.xlu1 %v1357_v2, %s1437_s9 }
 0x296   : > { %v524_v4 = vpop.permute.xlu1 %523 }
 0x297   : > { %v535_v5 = vsel %vm502_vm6, %v512_v3, %v524_v4 }
 0x298   : > { %v539_v6 = vpack.c.bf16 %v535_v5, %v535_v5 }
 0x299   : > { %513 = vrot.lane.b32.xlu2 %v482_v63, %s1437_s9  ;;  %1363 = vrot.lane.b32.xlu1 %v1357_v2, %s1442_s14 }
 0x29a   : > { %v562_v8 = vsel %vm557_vm7, %v539_v6, 0 }
 0x29b   : > { %571 = vmatpush.bf16.xpose.msra.mxu2 %v562_v8 }
 0x2a1   : > { %492 = vrot.lane.b32.xlu1 %v482_v63, %s1442_s14 }
 0x2a2   : > { %1196 = vmatmul.msk.bf16.vlgmr.msra.gmra.mxu2 %vm557_vm7, %v507_v11 }
 0x2eb   : > { %v1359_v12 = vpop.permute.xlu2 %1358 }
 0x2ec   : > { %v1361_v22 = vunpack.i.h.bf16 %v1359_v12  ;;  %v1360_v23 = vunpack.i.l.bf16 %v1359_v12 }
 0x2f0   : > { %v526_v14 = vpop.permute.xlu0 %525 }
 0x2f3   : > { %v514_v15 = vpop.permute.xlu2 %513 }
 0x2f4   : > { %v536_v16 = vsel %vm502_vm6, %v514_v15, %v526_v14 }
 0x2f5   : > { %v540_v18 = vpack.c.bf16 %v536_v16, %v536_v16 }
 0x2f7   : > { %v581_v19 = vsel %vm557_vm7, %v540_v18, 0 }
 0x2f8   : > { %590 = vmatpush.bf16.xpose.msrb.mxu0 %v581_v19 }
 0x300   : > { %705 = vmatpush.bf16.msra.mxu0 %v696_v20 }
 0x303   : > { %v1354_v21 = vpop.permute.xlu1 %1353 }
 0x304   : > { %v1356_v24 = vunpack.i.h.bf16 %v1354_v21  ;;  %v1355_v25 = vunpack.i.l.bf16 %v1354_v21 }
 0x306   : > { %v537_v26 = vsel %vm502_vm6, %v1355_v25, %v1360_v23  ;;  %v538_v27 = vsel %vm502_vm6, %v1356_v24, %v1361_v22 }
 0x307   : > { %v541_v28 = vpack.c.bf16 %v537_v26, %v537_v26  ;;  %v542_v29 = vpack.c.bf16 %v538_v27, %v538_v27 }
 0x309   : > { %v600_v30 = vsel %vm557_vm7, %v541_v28, 0  ;;  %v619_v31 = vsel %vm557_vm7, %v542_v29, 0 }
 0x30a   : > { %609 = vmatpush.bf16.xpose.msrb.mxu2 %v600_v30  ;;  %628 = vmatpush.bf16.xpose.msra.mxu3 %v619_v31 }
 0x30b   : > { %v1364_v32 = vpop.permute.xlu1 %1363 }
 0x30c   : > { %v1366_v33 = vunpack.i.h.bf16 %v1364_v32  ;;  %v1365_v34 = vunpack.i.l.bf16 %v1364_v32 }
 0x30e   : > { %v505_v35 = vsel %vm502_vm6, %v485_v0, %v1365_v34  ;;  %v506_v36 = vsel %vm502_vm6, %v488_v62, %v1366_v33 }
 0x30f   : > { %v509_v37 = vpack.c.bf16 %v505_v35, %v505_v35  ;;  %v510_v38 = vpack.c.bf16 %v506_v36, %v506_v36 }
 0x311   : > { %1198 = vmatmul.msk.bf16.vlgmr.msrb.gmra.mxu2 %vm557_vm7, %v509_v37  ;;  %1199 = vmatmul.msk.bf16.vlgmr.msra.gmra.mxu3 %vm557_vm7, %v510_v38 }
 0x313   : > { %v493_v39 = vpop.permute.xlu1 %492 }
 0x314   : > { %v504_v40 = vsel %vm502_vm6, %v482_v63, %v493_v39 }
 0x315   : > { %v508_v41 = vpack.c.bf16 %v504_v40, %v504_v40 }
 0x317   : > { %1197 = vmatmul.msk.bf16.vlgmr.msrb.gmra.mxu0 %vm557_vm7, %v508_v41 }
 0x325   : > { %v573_v42 = vpop.f32.mrf.mxu2 }
 0x326   : > { %v634_v54 = vmul.f32 0.25, %v573_v42 }
 0x328   : > { %v639_v61 = vadd.f32 %v638_v50, %v634_v54  ;;  %v1308_v54 = vld [vmem:[%s1513_s15 + $0x18] sm:$0xff] }
 0x329   : > { %825 = vmatpush.bf16.msrb.mxu0 %v1308_v54 }
 0x32a   : > { %v643_v62 = vsel %vm502_vm6, %v639_v61, -inf }
 0x32d   : > { %v575_v43 = vpop.f32.mrf.mxu2 }
 0x394   : > { %v592_v44 = vpop.f32.mrf.mxu0  ;;  %v611_v45 = vpop.f32.mrf.mxu2 }
 0x395   : > { %v635_v46 = vmul.f32 0.25, %v592_v44  ;;  %v636_v47 = vmul.f32 0.25, %v611_v45  ;;  %v630_v48 = vpop.f32.mrf.mxu3 }
 0x396   : > { %v637_v49 = vmul.f32 0.25, %v630_v48 }
 0x397   : > { %v641_v51 = vadd.f32 %v638_v50, %v636_v47  ;;  %v640_v52 = vadd.f32 %v638_v50, %v635_v46 }
 0x398   : > { %v642_v53 = vadd.f32 %v638_v50, %v637_v49 }
 0x399   : > { %v649_v55 = vsel %vm502_vm6, %v641_v51, -inf  ;;  %v646_v56 = vsel %vm502_vm6, %v640_v52, -inf }
 0x39a   : > { %v652_v57 = vsel %vm502_vm6, %v642_v53, -inf  ;;  %650 = vmax.xlane.f32.xlu2 %v649_v55  ;;  %647 = vmax.xlane.f32.xlu1 %v646_v56  ;;  %v1307_v55 = vld [vmem:[%s1513_s15 + $0x10] sm:$0xff]  ;;  %v1306_v56 = vld [vmem:[%s1513_s15 + $0x8] sm:$0xff] }
 0x39b   : > { %653 = vmax.xlane.f32.xlu0 %v652_v57  ;;  %826 = vmatpush.bf16.msrb.mxu0 %v1307_v55  ;;  %v1305_v57 = vld [vmem:[%s1513_s15] sm:$0xff] }
 0x39c   : > { %v594_v58 = vpop.f32.mrf.mxu0  ;;  %v613_v59 = vpop.f32.mrf.mxu2  ;;  %v1317_v55 = vld [vmem:[%s1523_s21] sm:$0xff] }
 0x39d   : > { %v632_v60 = vpop.f32.mrf.mxu3 }
 0x39f   : > { %827 = vmatpush.bf16.msrb.mxu0 %v1306_v56 }
 0x3a2   : > { %644 = vmax.xlane.f32.xlu2 %v643_v62 }
 0x3a3   : > { %828 = vmatpush.bf16.msrb.mxu0 %v1305_v57 }
 0x40d   : > { %v651_v63 = vpop.xlane.xlu2 %650  ;;  %v648_v0 = vpop.xlane.xlu1 %647 }
 0x40e   : > { %v654_v2 = vpop.xlane.xlu0 %653  ;;  %v657_v3 = vsub.f32 %v641_v51, %v651_v63  ;;  %v656_v4 = vsub.f32 %v640_v52, %v648_v0 }
 0x40f   : > { %v658_v5 = vsub.f32 %v642_v53, %v654_v2 }
 0x410   : > { %v663_v6 = vmul.f32 1.442695, %v657_v3  ;;  %v661_v7 = vmul.f32 1.442695, %v656_v4 }
 0x411   : > { %v665_v8 = vmul.f32 1.442695, %v658_v5 }
 0x412   : > { %1371 = vpow2.f32 %v663_v6 }
 0x413   : > { %1373 = vpow2.f32 %v665_v8 }
 0x414   : > { %1375 = vpow2.f32 %v661_v7 }
 0x415   : > { %v645_v17 = vpop.xlane.xlu2 %644 }
 0x416   : > { %v655_v18 = vsub.f32 %v639_v61, %v645_v17 }
 0x418   : > { %v1372_v10 = vpop.eup %1371  ;;  %v659_v19 = vmul.f32 1.442695, %v655_v18  ;;  %v1239_v18 = vld [vmem:[%s1518_s18 + $0x20] sm:$0xf] }
 0x419   : > { %v1374_v11 = vpop.eup %1373  ;;  %v673_v12 = vsel %vm502_vm6, %v1372_v10, 0.0 }
 0x41a   : > { %v1376_v14 = vpop.eup %1375  ;;  %v676_v15 = vsel %vm502_vm6, %v1374_v11, 0.0  ;;  %674 = vadd.xlane.f32.xlu0 %v673_v12  ;;  %1377 = vpow2.f32 %v659_v19  ;;  %v1316_v12 = vld [vmem:[%s1518_s18 + $0x34] sm:$0xf0]  ;;  %v1314_v19 = vld [vmem:[%s1518_s18 + $0x24] sm:$0xf0] }
 0x41b   : > { %677 = vadd.xlane.f32.xlu2 %v676_v15  ;;  %v670_v16 = vsel %vm502_vm6, %v1376_v14, 0.0 }
 0x41c   : > { %671 = vadd.xlane.f32.xlu1 %v670_v16  ;;  %v1249_v16 = vld [vmem:[%s1518_s18 + $0x38] sm:$0xf0] }
 0x420   : > { %v1378_v20 = vpop.eup %1377 }
 0x421   : > { %v667_v21 = vsel %vm502_vm6, %v1378_v20, 0.0 }
 0x42e   : > { %547 = vrot.lane.b32.xlu0 %v1571_v13, %s1437_s9 }
 0x433   : > { %550 = vrot.lane.b32.xlu2 %v1571_v13, %s1443_s19 }
 0x435   : > { %544 = vrot.lane.b32.xlu1 %v1571_v13, %s1439_s11 }
 0x458   : > { %668 = vadd.xlane.f32.xlu0 %v667_v21  ;;  %v1240_v21 = vor.u32 %v1314_v19, %v1239_v18 }
 0x48d   : > { %v675_v24 = vpop.xlane.xlu0 %674 }
 0x48e   : > { %v678_v22 = vpop.xlane.xlu2 %677 }
 0x48f   : > { %1379 = vrcp.f32 %v678_v22  ;;  %v672_v29 = vpop.xlane.xlu1 %671  ;;  %v1241_v22 = vld [vmem:[%s1518_s18 + $0x28] sm:$0xf0] }
 0x490   : > { %1381 = vrcp.f32 %v675_v24  ;;  %v1231_v24 = vld [vmem:[%s1518_s18 + $0x10] sm:$0xf] }
 0x491   : > { %1383 = vrcp.f32 %v672_v29  ;;  %v1223_v29 = vld [vmem:[%s1518_s18] sm:$0xf] }
 0x495   : > { %v1380_v23 = vpop.eup %1379 }
 0x496   : > { %v551_v25 = vpop.permute.xlu2 %550  ;;  %v686_v26 = vmul.f32 %v1380_v23, %v1374_v11  ;;  %v1382_v30 = vpop.eup %1381 }
 0x497   : > { %v556_v27 = vpack.c.bf16 %v551_v25, %v551_v25  ;;  %v685_v32 = vmul.f32 %v1382_v30, %v1372_v10  ;;  %v1384_v35 = vpop.eup %1383  ;;  %v1312_v25 = vld [vmem:[%s1518_s18 + $0x14] sm:$0xf0]  ;;  %v1310_v30 = vld [vmem:[%s1518_s18 + $0x4] sm:$0xf0] }
 0x498   : > { %v690_v13 = vpack.c.bf16 %v686_v26, %v686_v26  ;;  %v684_v38 = vmul.f32 %v1384_v35, %v1376_v14  ;;  %v1315_v14 = vld [vmem:[%s1518_s18 + $0x34] sm:$0xf] }
 0x499   : > { %v753_v28 = vsel %vm694_vm8, %v556_v27, 0  ;;  %v689_v36 = vpack.c.bf16 %v685_v32, %v685_v32  ;;  %v1252_v17 = vor.u32 %v1315_v14, %v1249_v16  ;;  %v1311_v26 = vld [vmem:[%s1518_s18 + $0x14] sm:$0xf]  ;;  %v1232_v27 = vor.u32 %v1312_v25, %v1231_v24 }
 0x49a   : > { %762 = vmatpush.bf16.msrb.mxu3 %v753_v28  ;;  %v688_v41 = vpack.c.bf16 %v684_v38, %v684_v38  ;;  %v1233_v28 = vld [vmem:[%s1518_s18 + $0x18] sm:$0xf0]  ;;  %v1224_v32 = vor.u32 %v1310_v30, %v1223_v29 }
 0x49d   : > { %1203 = vmatmul.msk.bf16.vlgmr.msrb.gmra.mxu3 %vm502_vm6, %v690_v13  ;;  %v1236_v13 = vor.u32 %v1311_v26, %v1233_v28 }
 0x4a0   : > { %v548_v31 = vpop.permute.xlu0 %547 }
 0x4a1   : > { %v555_v33 = vpack.c.bf16 %v548_v31, %v548_v31  ;;  %v1309_v31 = vld [vmem:[%s1518_s18 + $0x4] sm:$0xf] }
 0x4a3   : > { %v734_v34 = vsel %vm694_vm8, %v555_v33, 0  ;;  %v1225_v33 = vld [vmem:[%s1518_s18 + $0x8] sm:$0xf0] }
 0x4a4   : > { %743 = vmatpush.bf16.msra.mxu2 %v734_v34  ;;  %v1228_v34 = vor.u32 %v1309_v31, %v1225_v33 }
 0x4a7   : > { %v545_v37 = vpop.permute.xlu1 %544  ;;  %1202 = vmatmul.msk.bf16.vlgmr.msra.gmra.mxu2 %vm502_vm6, %v689_v36 }
 0x4a8   : > { %v554_v39 = vpack.c.bf16 %v545_v37, %v545_v37  ;;  %926 = vmatpush.bf16.msrb.mxu2 %v1252_v17 }
 0x4aa   : > { %v715_v40 = vsel %vm694_vm8, %v554_v39, 0 }
 0x4ab   : > { %724 = vmatpush.bf16.msrb.mxu1 %v715_v40 }
 0x4ae   : > { %1201 = vmatmul.msk.bf16.vlgmr.msrb.gmra.mxu1 %vm502_vm6, %v688_v41 }
 0x4cb   : > { %v669_v42 = vpop.xlane.xlu0 %668 }
 0x4cc   : > { %1385 = vrcp.f32 %v669_v42 }
 0x4d2   : > { %v1386_v43 = vpop.eup %1385 }
 0x4d3   : > { %v683_v44 = vmul.f32 %v1386_v43, %v1378_v20  ;;  %v1313_v20 = vld [vmem:[%s1518_s18 + $0x24] sm:$0xf] }
 0x4d4   : > { %v1244_v23 = vor.u32 %v1313_v20, %v1241_v22 }
 0x4d5   : > { %v687_v45 = vpack.c.bf16 %v683_v44, %v683_v44 }
 0x4d6   : > { %927 = vmatpush.bf16.msrb.mxu2 %v1244_v23 }
 0x4d7   : > { %1200 = vmatmul.msk.bf16.vlgmr.msra.gmra.mxu0 %vm502_vm6, %v687_v45 }
 0x4da   : > { %928 = vmatpush.bf16.msrb.mxu2 %v1236_v13 }
 0x4de   : > { %929 = vmatpush.bf16.msrb.mxu2 %v1228_v34 }
 0x520   : > { %v764_v46 = vpop.f32.mrf.mxu3 }
 0x528   : > { %v766_v47 = vpop.f32.mrf.mxu3 }
 0x529   : > { %v1324_v47 = vld [vmem:[%s1523_s21 + $0x38] sm:$0xff] }
 0x52a   : > { %v745_v48 = vpop.f32.mrf.mxu2  ;;  %1021 = vmatpush.bf16.msra.mxu3 %v1324_v47 }
 0x52b   : > { %v726_v49 = vpop.f32.mrf.mxu1  ;;  %773 = vrot.lane.b32.xlu1 %v745_v48, %s1444_s20  ;;  %v1323_v48 = vld [vmem:[%s1523_s21 + $0x30] sm:$0xff] }
 0x52c   : > { %769 = vrot.lane.b32.xlu2 %v726_v49, %s1445_s22  ;;  %v1322_v49 = vld [vmem:[%s1523_s21 + $0x28] sm:$0xff] }
 0x52e   : > { %1022 = vmatpush.bf16.msra.mxu3 %v1323_v48 }
 0x532   : > { %v747_v50 = vpop.f32.mrf.mxu2  ;;  %1023 = vmatpush.bf16.msra.mxu3 %v1322_v49 }
 0x533   : > { %v728_v51 = vpop.f32.mrf.mxu1  ;;  %v1321_v50 = vld [vmem:[%s1523_s21 + $0x20] sm:$0xff] }
 0x534   : > { %777 = vrot.lane.b32.xlu2 %v764_v46, %s1446_s23  ;;  %v1320_v51 = vld [vmem:[%s1523_s21 + $0x18] sm:$0xff] }
 0x536   : > { %1024 = vmatpush.bf16.msra.mxu3 %v1321_v50 }
 0x53a   : > { %1025 = vmatpush.bf16.msra.mxu3 %v1320_v51 }
 0x554   : > { %v707_v52 = vpop.f32.mrf.mxu0 }
 0x55c   : > { %v709_v53 = vpop.f32.mrf.mxu0 }
 0x55d   : > { %v1318_v53 = vld [vmem:[%s1523_s21 + $0x8] sm:$0xff] }
 0x586   : > { %v770_v58 = vpop.permute.xlu2 %769 }
 0x587   : > { %v780_v59 = vsel %vm557_vm7, %v707_v52, %v770_v58  ;;  %v1319_v52 = vld [vmem:[%s1523_s21 + $0x10] sm:$0xff] }
 0x588   : > { %1026 = vmatpush.bf16.msra.mxu3 %v1319_v52 }
 0x58c   : > { %1027 = vmatpush.bf16.msra.mxu3 %v1318_v53 }
 0x58e   : > { %v778_v61 = vpop.permute.xlu2 %777 }
 0x590   : > { %1028 = vmatpush.bf16.msra.mxu3 %v1317_v55 }
 0x59d   : > { %v774_v60 = vpop.permute.xlu1 %773 }
 0x59e   : > { %v782_v62 = vsel %vm781_vm9, %v780_v59, %v774_v60 }
 0x59f   : > { %v784_v63 = vsel %vm783_vm10, %v782_v62, %v778_v61 }
 0x5a0   : > { %v785_v0 = vpack.c.bf16 %v784_v63, %v784_v63 }
 0x5a2   : > { %1220 = vmatmul.msk.bf16.vlgmr.msrb.gmra.mxu0 %vm361_vm1, %v785_v0 }
 0x61f   : > { %v830_v2 = vpop.f32.mrf.mxu0 }
 0x620   : > { %v1618_v3 = vadd.f32 %v830_v2, %v1529_v1  ;;  %v1247_v1 = vld [vmem:[%s1518_s18 + $0x30] sm:$0xf] }
 0x621   : > { %v1248_v15 = vor.u32 %v1316_v12, %v1247_v1 }
 0x622   : > { %v835_v4 = vsel %vm361_vm1, %v1618_v3, 0.0 }
 0x623   : > { %836 = vadd.xlane.f32.xlu1 %v835_v4  ;;  %913 = vmatpush.bf16.msra.mxu1 %v1248_v15 }
 0x627   : > { %v832_v5 = vpop.f32.mrf.mxu0  ;;  %914 = vmatpush.bf16.msra.mxu1 %v1240_v21 }
 0x62b   : > { %915 = vmatpush.bf16.msra.mxu1 %v1232_v27 }
 0x62f   : > { %916 = vmatpush.bf16.msra.mxu1 %v1224_v32 }
 0x696   : > { %v837_v6 = vpop.xlane.xlu1 %836 }
 0x697   : > { %v838_v7 = vmul.f32 %v837_v6, %v1533_v9 }
 0x699   : > { %v839_v8 = vsub.f32 %v1618_v3, %v838_v7 }
 0x69b   : > { %v840_v10 = vmul.f32 %v839_v8, %v839_v8 }
 0x69d   : > { %v841_v11 = vsel %vm361_vm1, %v840_v10, 0.0 }
 0x69e   : > { %842 = vadd.xlane.f32.xlu2 %v841_v11 }
 0x711   : > { %v843_v35 = vpop.xlane.xlu2 %842 }
 0x712   : > { %v844_v36 = vmul.f32 %v843_v35, %v1533_v9 }
 0x714   : > { %v845_v37 = vadd.f32 1e-05, %v844_v36 }
 0x716   : > { %1387 = vrsqrt.f32 %v845_v37  ;;  %vm852_vm12 = vweird.f32 %v845_v37 }
 0x71c   : > { %v1388_v38 = vpop.eup %1387 }
 0x71d   : > { %v847_v39 = vmul.f32 %v1388_v38, %v845_v37  ;;  %vm853_vm11 = vweird.f32 %v1388_v38 }
 0x71e   : > { %vm854_vm13 = vmor %vm852_vm12, %vm853_vm11 }
 0x71f   : > { %v848_v40 = vmul.f32 %v1388_v38, %v847_v39 }
 0x721   : > { %v849_v41 = vmul.f32 0.5, %v848_v40 }
 0x723   : > { %v850_v42 = vsub.f32 1.5, %v849_v41 }
 0x725   : > { %v851_v43 = vmul.f32 %v1388_v38, %v850_v42 }
 0x727   : > { %v855_v44 = vsel %vm854_vm13, %v1388_v38, %v851_v43 }
 0x728   : > { %v856_v45 = vmul.f32 %v855_v44, %v839_v8 }
 0x72a   : > { %v857_v46 = vpack.c.bf16 %v856_v45, %v856_v45 }
 0x72c   : > { %1253 = vmatmul.msk.bf16.vlgmr.msra.gmra.mxu1 %vm361_vm1, %v857_v46  ;;  %1254 = vmatmul.msk.bf16.vlgmr.msrb.gmra.mxu2 %vm361_vm1, %v857_v46 }
 0x7a9   : > { %v918_v54 = vpop.f32.mrf.mxu1 }
 0x7aa   : > { %v1255_v56 = vmul.f32 -1.442695, %v918_v54 }
 0x7ac   : > { %1389 = vpow2.f32 %v1255_v56 }
 0x7af   : > { %v931_v57 = vpop.f32.mrf.mxu2 }
 0x7b1   : > { %v920_v58 = vpop.f32.mrf.mxu1 }
 0x7b2   : > { %v1390_v59 = vpop.eup %1389 }
 0x7b3   : > { %v938_v60 = vadd.f32 1.0, %v1390_v59 }
 0x7b5   : > { %1391 = vrcp.f32 %v938_v60  ;;  %v950_v2 = vand.u32 2147483648, %v938_v60  ;;  %v948_v5 = vand.u32 2147483647, %v938_v60  ;;  %vm944_vm15 = vweird.f32 %v938_v60 }
 0x7b7   : > { %v933_v61 = vpop.f32.mrf.mxu2  ;;  %v951_v7 = vor.u32 1.1754944e-38, %v950_v2  ;;  %vm949_vm2 = vcmp.eq.f32.partialorder %v948_v5, 8.507059e+37 }
 0x7bb   : > { %v1392_v62 = vpop.eup %1391 }
 0x7bc   : > { %v940_v63 = vmul.f32 %v1392_v62, %v938_v60  ;;  %vm945_vm14 = vweird.f32 %v1392_v62 }
 0x7bd   : > { %vm946_vm0 = vmor %vm944_vm15, %vm945_vm14 }
 0x7be   : > { %v941_v0 = vsub.f32 1.0, %v940_v63 }
 0x7c0   : > { %v942_v4 = vmul.f32 %v1392_v62, %v941_v0 }
 0x7c2   : > { %v943_v6 = vadd.f32 %v1392_v62, %v942_v4 }
 0x7c4   : > { %v947_v8 = vsel %vm946_vm0, %v1392_v62, %v943_v6 }
 0x7c5   : > { %v952_v10 = vsel %vm949_vm2, %v951_v7, %v947_v8 }
 0x7c6   : > { %v954_v11 = vmul.f32 %v952_v10, %v918_v54 }
 0x7c8   : > { %v955_v1 = vmul.f32 %v954_v11, %v931_v57 }
 0x7ca   : > { %v956_v12 = vpack.c.bf16 %v955_v1, %v955_v1 }
 0x7cc   : > { %1029 = vmatmul.bf16.vlgmr.msra.gmra.mxu3 %v956_v12 }
 0x84f   : > { %v1030_v14 = vpop.f32.mrf.mxu3 }
 0x850   : > { %v1034_v15 = vadd.f32 %v1030_v14, %v1618_v3 }
 0x852   : > { %1035 = vst.msk [vmem:[#allocation2] sm:$0xff] %vm361_vm1, %v1034_v15 }
 0x853   : > { %1039 = sbr.rel (%p1288_p5) target bundleno = 2401 (0x961), region = 60 }
 0x857   : > { %v1032_v16 = vpop.f32.mrf.mxu3 }
 0x858   : > { %v1040_v17 = vsel %vm361_vm1, %v1034_v15, 0.0 }
 0x859   : > { %1041 = vadd.xlane.f32.xlu0 %v1040_v17 }
 0x8cc   : > { %v1042_v18 = vpop.xlane.xlu0 %1041 }
 0x8cd   : > { %v1043_v19 = vmul.f32 %v1042_v18, %v1533_v9 }
 0x8cf   : > { %v1044_v20 = vsub.f32 %v1034_v15, %v1043_v19 }
 0x8d1   : > { %v1045_v21 = vmul.f32 %v1044_v20, %v1044_v20 }
 0x8d3   : > { %v1046_v22 = vsel %vm361_vm1, %v1045_v21, 0.0 }
 0x8d4   : > { %1047 = vadd.xlane.f32.xlu0 %v1046_v22 }
 0x947   : > { %v1048_v23 = vpop.xlane.xlu0 %1047 }
 0x948   : > { %v1049_v3 = vmul.f32 %v1048_v23, %v1533_v9 }
 0x94a   : > { %v1050_v24 = vadd.f32 1e-05, %v1049_v3 }
 0x94c   : > { %1393 = vrsqrt.f32 %v1050_v24  ;;  %vm1057_vm4 = vweird.f32 %v1050_v24 }
 0x952   : > { %v1394_v25 = vpop.eup %1393 }
 0x953   : > { %v1052_v26 = vmul.f32 %v1394_v25, %v1050_v24  ;;  %vm1058_vm3 = vweird.f32 %v1394_v25 }
 0x954   : > { %vm1059_vm5 = vmor %vm1057_vm4, %vm1058_vm3 }
 0x955   : > { %v1053_v27 = vmul.f32 %v1394_v25, %v1052_v26 }
 0x957   : > { %v1054_v28 = vmul.f32 0.5, %v1053_v27 }
 0x959   : > { %v1055_v13 = vsub.f32 1.5, %v1054_v28 }
 0x95b   : > { %v1056_v29 = vmul.f32 %v1394_v25, %v1055_v13 }
 0x95d   : > { %v1060_v30 = vsel %vm1059_vm5, %v1394_v25, %v1056_v29 }
 0x95e   : > { %v1061_v31 = vmul.f32 %v1060_v30, %v1044_v20 }
 0x960   : > { %1062 = vst.msk [vmem:[#allocation3] sm:$0xff] %vm361_vm1, %v1061_v31 }
 0x961 PF: > { %p1329_p6 = scmp.eq.s32.totalorder %s1499_s28, 1  ;;  %s1447_s15 = smov [#allocation3]  }
 0x962   : > { %s1069_s18 = sshll.u32 %s1447_s15, 4  ;;  %s1071_s25 = sshll.u32 %s1675_s8, 4  ;;  %s1070_s18 = int_to_ptr.vmem [resolvable:$true] %s1069_s18  ;;  %s1072_s25 = int_to_ptr.hbm [resolvable:$true] %s1071_s25 }
 0x963   : > { %1326 = dma.vmem_to_hbm [thread:$0]  (%p1329_p6), %s1070_s18, 128, %s1072_s25, [#allocation4]  }
 0x964   : > { %1428 = dma.done.wait (%p1329_p6), [#allocation4], 128  }
 0x965   : > { %1430 = vsyncadd (%p1329_p6), [#allocation4], 4294967168 }
 0x966 PF: > { %s19_s27 = sadd.s32 1, %s1433_s27  }
 0x967   : > { %p16_p7 = scmp.ge.s32.totalorder %s19_s27, 4  }
 0x969   :  { %18 = sbr.rel (!%p16_p7) target bundleno = 1 (0x1), region = 96 }
 0x96e   :  { %1085 = vsyncpa [#allocation4], 1 }
 0x96f   :  { %1087 = vsyncpa [#allocation4 + $0x1], 1 }

</bundles_post_ra>
